<compile_context>
chip_gen: v6e
topology: v6e:2x2x1
jax: 0.10.0
libtpu: 0.0.40
codegen_flags: <defaults>
</compile_context>

<pallas_src>
import functools

import jax
import jax.numpy as jnp
from jax.experimental import pallas as pl
from jax.experimental.pallas import tpu as pltpu


def _round_up(x, m):
    return (x + m - 1) // m * m


def _sigmoid(x):
    # sigmoid(x) == 0.5 * tanh(0.5 * x) + 0.5 : one EUP op instead of exp+recip.
    return 0.5 * jnp.tanh(0.5 * x) + 0.5


# ----------------------------------------------------------------------------
# Kernel: single invocation, statically unrolled loop over layers.
# ----------------------------------------------------------------------------
def _stacked_lstm_kernel(x_ref, h0_ref, c0_ref, w_ref, b_ref,
                         h1_ref, c1_ref, xh_ref):
    L, Bt, H = h0_ref.shape
    in_sz = x_ref.shape[-1]
    Kin = xh_ref.shape[-1]
    Kx = Kin - H                      # width of the layer-input slot

    # Seed the fused [x | h] matmul buffer.  Explicitly zero the (static)
    # padding lanes so correctness never depends on zero rows in W.
    xh_ref[:, :in_sz] = x_ref[...].astype(xh_ref.dtype)
    if in_sz < Kx:
        xh_ref[:, in_sz:Kx] = jnp.zeros((Bt, Kx - in_sz), xh_ref.dtype)

    # Layers are inherently sequential; L is small and static, so a full
    # unroll gives the scheduler the whole chain.
    for l in range(L):
        # This layer's recurrent state goes into the h slot.
        xh_ref[:, Kx:] = h0_ref[l].astype(xh_ref.dtype)

        # One fused MXU matmul over the stacked [W_ih ; W_hh] weight
        # (bf16 in, f32 accumulate) + combined bias.
        gates = jnp.dot(xh_ref[...], w_ref[l],
                        preferred_element_type=jnp.float32) + b_ref[l]

        # Gates are packed contiguously: [i | f | g | o], each width H.
        i_g = _sigmoid(gates[:, 0 * H:1 * H])
        f_g = _sigmoid(gates[:, 1 * H:2 * H])
        g_g = jnp.tanh(gates[:, 2 * H:3 * H])
        o_g = _sigmoid(gates[:, 3 * H:4 * H])

        c1 = f_g * c0_ref[l] + i_g * g_g
        h1 = o_g * jnp.tanh(c1)

        h1_ref[l] = h1.astype(h1_ref.dtype)
        c1_ref[l] = c1.astype(c1_ref.dtype)

        if l + 1 < L:
            # Next layer's input = h1 (dropout between layers is identity in
            # eval mode).  Zero any leftover input-slot lanes explicitly.
            xh_ref[:, :H] = h1.astype(xh_ref.dtype)
            if H < Kx:
                xh_ref[:, H:Kx] = jnp.zeros((Bt, Kx - H), xh_ref.dtype)


# ----------------------------------------------------------------------------
# Wrapper: single fused pallas_call, everything VMEM-resident.
# ----------------------------------------------------------------------------
@jax.jit
def stacked_lstm_forward(x, h0, c0, W, Bias):
    """Mirrors StackedLSTM.forward: returns (output, (h_1, c_1))."""
    L, Bt, H = h0.shape
    in_sz = x.shape[-1]
    Kx = max(in_sz, H)
    Kin = Kx + H

    # Conservative scoped-VMEM sizing: resident bytes x2, clamped to [32, 64] MiB.
    resident = (W.size * jnp.dtype(W.dtype).itemsize
                + Bias.size * 4
                + (x.size + 3 * h0.size + 3 * c0.size) * 4
                + Bt * Kin * 2)
    vmem_limit = int(min(64 * 1024 * 1024, max(32 * 1024 * 1024, 2 * resident)))

    h1, c1 = pl.pallas_call(
        _stacked_lstm_kernel,
        out_shape=(
            jax.ShapeDtypeStruct((L, Bt, H), jnp.float32),
            jax.ShapeDtypeStruct((L, Bt, H), jnp.float32),
        ),
        grid_spec=pltpu.PrefetchScalarGridSpec(
            num_scalar_prefetch=0,
            grid=(1,),
            in_specs=[
                pl.BlockSpec((Bt, in_sz), lambda i: (0, 0)),        # x
                pl.BlockSpec((L, Bt, H), lambda i: (0, 0, 0)),      # h0
                pl.BlockSpec((L, Bt, H), lambda i: (0, 0, 0)),      # c0
                pl.BlockSpec(W.shape, lambda i: (0, 0, 0)),         # W (resident)
                pl.BlockSpec(Bias.shape, lambda i: (0, 0, 0)),      # bias
            ],
            out_specs=(
                pl.BlockSpec((L, Bt, H), lambda i: (0, 0, 0)),      # h1
                pl.BlockSpec((L, Bt, H), lambda i: (0, 0, 0)),      # c1
            ),
            scratch_shapes=[pltpu.VMEM((Bt, Kin), jnp.bfloat16)],   # running [x|h]
        ),
        compiler_params=pltpu.CompilerParams(
            dimension_semantics=("arbitrary",),
            vmem_limit_bytes=vmem_limit),
    )(x, h0, c0, W, Bias)

    return h1[-1], (h1, c1)


# ----------------------------------------------------------------------------
# Parameter construction / packing.
# ----------------------------------------------------------------------------
def init_params(key, num_layers, input_size, hidden_size, dtype=jnp.float32):
    """Per-layer raw params with nn.LSTMCell shapes (uniform(-1/sqrt(H), 1/sqrt(H)))."""
    params = []
    k = 1.0 / float(hidden_size) ** 0.5
    in_sz = input_size
    for _ in range(num_layers):
        key, k1, k2, k3, k4 = jax.random.split(key, 5)
        params.append({
            "w_ih": jax.random.uniform(k1, (4 * hidden_size, in_sz), dtype, -k, k),
            "w_hh": jax.random.uniform(k2, (4 * hidden_size, hidden_size), dtype, -k, k),
            "b_ih": jax.random.uniform(k3, (4 * hidden_size,), dtype, -k, k),
            "b_hh": jax.random.uniform(k4, (4 * hidden_size,), dtype, -k, k),
        })
        in_sz = hidden_size
    return params


def pack_params(params, input_size, hidden_size, compute_dtype=jnp.bfloat16):
    """Stack per-layer weights into the fused, contiguously-gate-packed layout.

    Returns:
      W:    (L, Kin, G4) compute_dtype with Kin = max(input_size,H) + H and
            G4 = round_up(4*H, 128).  Rows [0:in_sz) hold W_ih^T, rows
            [Kx:Kx+H) hold W_hh^T; gate g occupies columns [g*H, (g+1)*H).
      Bias: (L, 1, G4) float32 -- b_ih + b_hh, zero in the padded columns.
    """
    L = len(params)
    H = hidden_size
    Kx = max(input_size, H)
    Kin = Kx + H
    G4 = _round_up(4 * H, 128)

    W = jnp.zeros((L, Kin, G4), jnp.float32)
    Bias = jnp.zeros((L, 1, G4), jnp.float32)
    for l, p in enumerate(params):
        in_sz = input_size if l == 0 else H
        W = W.at[l, :in_sz, :4 * H].set(p["w_ih"].T)
        W = W.at[l, Kx:Kx + H, :4 * H].set(p["w_hh"].T)
        Bias = Bias.at[l, :, :4 * H].set((p["b_ih"] + p["b_hh"]).reshape(1, 4 * H))
    return W.astype(compute_dtype), Bias


# ----------------------------------------------------------------------------
# References for correctness checks.
# ----------------------------------------------------------------------------
def _reference_forward_packed(x, h0, c0, W, Bias, input_size, hidden_size):
    """Pure-JAX replica of the kernel math on the same packed bf16 weights."""
    L, Bt, H = h0.shape
    Kx = max(input_size, H)

    x_slot = (jnp.zeros((Bt, Kx), jnp.bfloat16)
              .at[:, :input_size].set(x.astype(jnp.bfloat16)))
    c0f = c0.astype(jnp.float32)

    h1s, c1s = [], []
    for l in range(L):
        xh = jnp.concatenate([x_slot, h0[l].astype(jnp.bfloat16)], axis=-1)
        gates = jnp.dot(xh, W[l], preferred_element_type=jnp.float32) + Bias[l]
        ig = _sigmoid(gates[:, 0 * H:1 * H])
        fg = _sigmoid(gates[:, 1 * H:2 * H])
        gg = jnp.tanh(gates[:, 2 * H:3 * H])
        og = _sigmoid(gates[:, 3 * H:4 * H])
        c1 = fg * c0f[l] + ig * gg
        h1 = og * jnp.tanh(c1)
        h1s.append(h1)
        c1s.append(c1)
        x_slot = (jnp.zeros((Bt, Kx), jnp.bfloat16)
                  .at[:, :H].set(h1.astype(jnp.bfloat16)))
    h1 = jnp.stack(h1s)
    c1 = jnp.stack(c1s)
    return h1[-1], (h1, c1)


def _reference_forward_raw(x, h0, c0, raw_params):
    """Full-precision torch-style StackedLSTM reference (no packing, f32)."""
    inp = x
    H = h0.shape[-1]
    h1s, c1s = [], []
    for l, p in enumerate(raw_params):
        gates = inp @ p["w_ih"].T + h0[l] @ p["w_hh"].T + p["b_ih"] + p["b_hh"]
        ig = jax.nn.sigmoid(gates[:, 0 * H:1 * H])
        fg = jax.nn.sigmoid(gates[:, 1 * H:2 * H])
        gg = jnp.tanh(gates[:, 2 * H:3 * H])
        og = jax.nn.sigmoid(gates[:, 3 * H:4 * H])
        c1 = fg * c0[l] + ig * gg
        h1 = og * jnp.tanh(c1)
        inp = h1  # eval-mode dropout == identity
        h1s.append(h1)
        c1s.append(c1)
    return inp, (jnp.stack(h1s), jnp.stack(c1s))


# ----------------------------------------------------------------------------
if __name__ == "__main__":
    num_layers = 3
    batch = 8
    input_size = 16
    hidden_size = 32
    dropout = 0.0  # eval-mode / identity

    key = jax.random.PRNGKey(0)
    kx, kh, kc, kp = jax.random.split(key, 4)
    x = jax.random.normal(kx, (batch, input_size), jnp.float32)
    h0 = jax.random.normal(kh, (num_layers, batch, hidden_size), jnp.float32)
    c0 = jax.random.normal(kc, (num_layers, batch, hidden_size), jnp.float32)

    raw_params = init_params(kp, num_layers, input_size, hidden_size)
    W, Bias = pack_params(raw_params, input_size, hidden_size)

    out, (h1, c1) = stacked_lstm_forward(x, h0, c0, W, Bias)
    jax.block_until_ready((out, h1, c1))

    assert out.shape == (batch, hidden_size)
    assert h1.shape == (num_layers, batch, hidden_size)
    assert c1.shape == (num_layers, batch, hidden_size)

    # Check 1: exact-math reference on the same packed bf16 weights.
    ref_out, (ref_h1, ref_c1) = _reference_forward_packed(
        x, h0, c0, W, Bias, input_size, hidden_size)
    assert jnp.allclose(out, ref_out, atol=1e-3, rtol=1e-3)
    assert jnp.allclose(h1, ref_h1, atol=1e-3, rtol=1e-3)
    assert jnp.allclose(c1, ref_c1, atol=1e-3, rtol=1e-3)

    # Check 2: full-precision torch-semantics reference (loose tol: bf16 weights).
    f32_out, (f32_h1, f32_c1) = _reference_forward_raw(x, h0, c0, raw_params)
    assert jnp.allclose(out, f32_out, atol=5e-2, rtol=5e-2)
    assert jnp.allclose(h1, f32_h1, atol=5e-2, rtol=5e-2)
    assert jnp.allclose(c1, f32_c1, atol=5e-2, rtol=5e-2)

    print("KERNEL_OK")
</pallas_src>

<mosaic_0001>
module attributes {stable_mosaic.version = 11 : i64} {
  func.func @_stacked_lstm_kernel(%arg0: i32, %arg1: memref<8x16xf32, #tpu.memory_space<vmem>>, %arg2: memref<3x8x32xf32, #tpu.memory_space<vmem>>, %arg3: memref<3x8x32xf32, #tpu.memory_space<vmem>>, %arg4: memref<3x64x128xbf16, #tpu.memory_space<vmem>>, %arg5: memref<3x1x128xf32, #tpu.memory_space<vmem>>, %arg6: memref<3x8x32xf32, #tpu.memory_space<vmem>>, %arg7: memref<3x8x32xf32, #tpu.memory_space<vmem>>, %arg8: memref<8x64xbf16, #tpu.memory_space<vmem>>) attributes {dimension_semantics = [#tpu.dimension_semantics<arbitrary>], iteration_bounds = array<i64: 1>, scalar_prefetch = 0 : i64, scratch_operands = 1 : i64, tpu.core_type = #tpu.core_type<tc>, window_params = [{pipeline_mode = #tpu.pipeline_mode<synchronous>, transform_indices = @transform_0, window_bounds = array<i64: 8, 16>}, {pipeline_mode = #tpu.pipeline_mode<synchronous>, transform_indices = @transform_1, window_bounds = array<i64: 3, 8, 32>}, {pipeline_mode = #tpu.pipeline_mode<synchronous>, transform_indices = @transform_2, window_bounds = array<i64: 3, 8, 32>}, {pipeline_mode = #tpu.pipeline_mode<synchronous>, transform_indices = @transform_3, window_bounds = array<i64: 3, 64, 128>}, {pipeline_mode = #tpu.pipeline_mode<synchronous>, transform_indices = @transform_4, window_bounds = array<i64: 3, 1, 128>}, {pipeline_mode = #tpu.pipeline_mode<synchronous>, transform_indices = @transform_5, window_bounds = array<i64: 3, 8, 32>}, {pipeline_mode = #tpu.pipeline_mode<synchronous>, transform_indices = @transform_6, window_bounds = array<i64: 3, 8, 32>}]} {
    %c0 = arith.constant 0 : index
    %c0_0 = arith.constant 0 : index
    %0 = vector.load %arg1[%c0, %c0_0] : memref<8x16xf32, #tpu.memory_space<vmem>>, vector<8x16xf32>
    %1 = arith.truncf %0 : vector<8x16xf32> to vector<8x16xbf16>
    %c0_1 = arith.constant 0 : index
    %c0_2 = arith.constant 0 : index
    %2 = vector.load %arg8[%c0_1, %c0_2] : memref<8x64xbf16, #tpu.memory_space<vmem>>, vector<8x16xbf16>
    tpu.vector_store %arg8[%c0_1, %c0_2], %1 {strides = array<i32>} : memref<8x64xbf16, #tpu.memory_space<vmem>>, vector<8x16xbf16>,
    %cst = arith.constant 0.000000e+00 : bf16
    %3 = vector.broadcast %cst : bf16 to vector<8x16xbf16>
    %c0_3 = arith.constant 0 : index
    %c16 = arith.constant 16 : index
    %4 = vector.load %arg8[%c0_3, %c16] : memref<8x64xbf16, #tpu.memory_space<vmem>>, vector<8x16xbf16>
    tpu.vector_store %arg8[%c0_3, %c16], %3 {strides = array<i32>} : memref<8x64xbf16, #tpu.memory_space<vmem>>, vector<8x16xbf16>,
    %c0_4 = arith.constant 0 : index
    %c0_5 = arith.constant 0 : index
    %c0_6 = arith.constant 0 : index
    %5 = vector.load %arg2[%c0_4, %c0_5, %c0_6] : memref<3x8x32xf32, #tpu.memory_space<vmem>>, vector<1x8x32xf32>
    %6 = vector.shape_cast %5 : vector<1x8x32xf32> to vector<8x32xf32>
    %7 = arith.truncf %6 : vector<8x32xf32> to vector<8x32xbf16>
    %c0_7 = arith.constant 0 : index
    %c32 = arith.constant 32 : index
    %8 = vector.load %arg8[%c0_7, %c32] : memref<8x64xbf16, #tpu.memory_space<vmem>>, vector<8x32xbf16>
    tpu.vector_store %arg8[%c0_7, %c32], %7 {strides = array<i32>} : memref<8x64xbf16, #tpu.memory_space<vmem>>, vector<8x32xbf16>,
    %c0_8 = arith.constant 0 : index
    %c0_9 = arith.constant 0 : index
    %9 = vector.load %arg8[%c0_8, %c0_9] : memref<8x64xbf16, #tpu.memory_space<vmem>>, vector<8x64xbf16>
    %c0_10 = arith.constant 0 : index
    %c0_11 = arith.constant 0 : index
    %c0_12 = arith.constant 0 : index
    %10 = vector.load %arg4[%c0_10, %c0_11, %c0_12] : memref<3x64x128xbf16, #tpu.memory_space<vmem>>, vector<1x64x128xbf16>
    %11 = vector.shape_cast %10 : vector<1x64x128xbf16> to vector<64x128xbf16>
    %cst_13 = arith.constant dense<0.000000e+00> : vector<8x128xf32>
    %12 = tpu.matmul %9, %11, %cst_13 {dimension_numbers = #tpu.dot_dimension_numbers<[1], [0], [0], [1], [0, 0, 1, 1], [], []>} : vector<8x64xbf16>, vector<64x128xbf16>, vector<8x128xf32> -> vector<8x128xf32>
    %c0_14 = arith.constant 0 : index
    %c0_15 = arith.constant 0 : index
    %c0_16 = arith.constant 0 : index
    %13 = vector.load %arg5[%c0_14, %c0_15, %c0_16] : memref<3x1x128xf32, #tpu.memory_space<vmem>>, vector<1x1x128xf32>
    %14 = vector.shape_cast %13 : vector<1x1x128xf32> to vector<1x128xf32>
    %15 = vector.broadcast %14 : vector<1x128xf32> to vector<8x128xf32>
    %16 = arith.addf %12, %15 : vector<8x128xf32>
    %17 = vector.extract_strided_slice %16 {offsets = [0, 0], sizes = [8, 32], strides = [1, 1]} : vector<8x128xf32> to vector<8x32xf32>
    %cst_17 = arith.constant 5.000000e-01 : f32
    %18 = vector.broadcast %cst_17 : f32 to vector<8x32xf32>
    %19 = arith.mulf %18, %17 : vector<8x32xf32>
    %20 = math.tanh %19 : vector<8x32xf32>
    %cst_18 = arith.constant 5.000000e-01 : f32
    %21 = vector.broadcast %cst_18 : f32 to vector<8x32xf32>
    %22 = arith.mulf %21, %20 : vector<8x32xf32>
    %cst_19 = arith.constant 5.000000e-01 : f32
    %23 = vector.broadcast %cst_19 : f32 to vector<8x32xf32>
    %24 = arith.addf %22, %23 : vector<8x32xf32>
    %25 = vector.extract_strided_slice %16 {offsets = [0, 32], sizes = [8, 32], strides = [1, 1]} : vector<8x128xf32> to vector<8x32xf32>
    %cst_20 = arith.constant 5.000000e-01 : f32
    %26 = vector.broadcast %cst_20 : f32 to vector<8x32xf32>
    %27 = arith.mulf %26, %25 : vector<8x32xf32>
    %28 = math.tanh %27 : vector<8x32xf32>
    %cst_21 = arith.constant 5.000000e-01 : f32
    %29 = vector.broadcast %cst_21 : f32 to vector<8x32xf32>
    %30 = arith.mulf %29, %28 : vector<8x32xf32>
    %cst_22 = arith.constant 5.000000e-01 : f32
    %31 = vector.broadcast %cst_22 : f32 to vector<8x32xf32>
    %32 = arith.addf %30, %31 : vector<8x32xf32>
    %33 = vector.extract_strided_slice %16 {offsets = [0, 64], sizes = [8, 32], strides = [1, 1]} : vector<8x128xf32> to vector<8x32xf32>
    %34 = math.tanh %33 : vector<8x32xf32>
    %35 = vector.extract_strided_slice %16 {offsets = [0, 96], sizes = [8, 32], strides = [1, 1]} : vector<8x128xf32> to vector<8x32xf32>
    %cst_23 = arith.constant 5.000000e-01 : f32
    %36 = vector.broadcast %cst_23 : f32 to vector<8x32xf32>
    %37 = arith.mulf %36, %35 : vector<8x32xf32>
    %38 = math.tanh %37 : vector<8x32xf32>
    %cst_24 = arith.constant 5.000000e-01 : f32
    %39 = vector.broadcast %cst_24 : f32 to vector<8x32xf32>
    %40 = arith.mulf %39, %38 : vector<8x32xf32>
    %cst_25 = arith.constant 5.000000e-01 : f32
    %41 = vector.broadcast %cst_25 : f32 to vector<8x32xf32>
    %42 = arith.addf %40, %41 : vector<8x32xf32>
    %c0_26 = arith.constant 0 : index
    %c0_27 = arith.constant 0 : index
    %c0_28 = arith.constant 0 : index
    %43 = vector.load %arg3[%c0_26, %c0_27, %c0_28] : memref<3x8x32xf32, #tpu.memory_space<vmem>>, vector<1x8x32xf32>
    %44 = vector.shape_cast %43 : vector<1x8x32xf32> to vector<8x32xf32>
    %45 = arith.mulf %32, %44 : vector<8x32xf32>
    %46 = arith.mulf %24, %34 : vector<8x32xf32>
    %47 = arith.addf %45, %46 : vector<8x32xf32>
    %48 = math.tanh %47 : vector<8x32xf32>
    %49 = arith.mulf %42, %48 : vector<8x32xf32>
    %c0_29 = arith.constant 0 : index
    %c0_30 = arith.constant 0 : index
    %c0_31 = arith.constant 0 : index
    %50 = vector.load %arg6[%c0_29, %c0_30, %c0_31] : memref<3x8x32xf32, #tpu.memory_space<vmem>>, vector<1x8x32xf32>
    %51 = vector.shape_cast %50 : vector<1x8x32xf32> to vector<8x32xf32>
    %52 = vector.shape_cast %49 : vector<8x32xf32> to vector<1x8x32xf32>
    tpu.vector_store %arg6[%c0_29, %c0_30, %c0_31], %52 {strides = array<i32>} : memref<3x8x32xf32, #tpu.memory_space<vmem>>, vector<1x8x32xf32>,
    %c0_32 = arith.constant 0 : index
    %c0_33 = arith.constant 0 : index
    %c0_34 = arith.constant 0 : index
    %53 = vector.load %arg7[%c0_32, %c0_33, %c0_34] : memref<3x8x32xf32, #tpu.memory_space<vmem>>, vector<1x8x32xf32>
    %54 = vector.shape_cast %53 : vector<1x8x32xf32> to vector<8x32xf32>
    %55 = vector.shape_cast %47 : vector<8x32xf32> to vector<1x8x32xf32>
    tpu.vector_store %arg7[%c0_32, %c0_33, %c0_34], %55 {strides = array<i32>} : memref<3x8x32xf32, #tpu.memory_space<vmem>>, vector<1x8x32xf32>,
    %56 = arith.truncf %49 : vector<8x32xf32> to vector<8x32xbf16>
    %c0_35 = arith.constant 0 : index
    %c0_36 = arith.constant 0 : index
    %57 = vector.load %arg8[%c0_35, %c0_36] : memref<8x64xbf16, #tpu.memory_space<vmem>>, vector<8x32xbf16>
    tpu.vector_store %arg8[%c0_35, %c0_36], %56 {strides = array<i32>} : memref<8x64xbf16, #tpu.memory_space<vmem>>, vector<8x32xbf16>,
    %c1 = arith.constant 1 : index
    %c0_37 = arith.constant 0 : index
    %c0_38 = arith.constant 0 : index
    %58 = vector.load %arg2[%c1, %c0_37, %c0_38] : memref<3x8x32xf32, #tpu.memory_space<vmem>>, vector<1x8x32xf32>
    %59 = vector.shape_cast %58 : vector<1x8x32xf32> to vector<8x32xf32>
    %60 = arith.truncf %59 : vector<8x32xf32> to vector<8x32xbf16>
    %c0_39 = arith.constant 0 : index
    %c32_40 = arith.constant 32 : index
    %61 = vector.load %arg8[%c0_39, %c32_40] : memref<8x64xbf16, #tpu.memory_space<vmem>>, vector<8x32xbf16>
    tpu.vector_store %arg8[%c0_39, %c32_40], %60 {strides = array<i32>} : memref<8x64xbf16, #tpu.memory_space<vmem>>, vector<8x32xbf16>,
    %c0_41 = arith.constant 0 : index
    %c0_42 = arith.constant 0 : index
    %62 = vector.load %arg8[%c0_41, %c0_42] : memref<8x64xbf16, #tpu.memory_space<vmem>>, vector<8x64xbf16>
    %c1_43 = arith.constant 1 : index
    %c0_44 = arith.constant 0 : index
    %c0_45 = arith.constant 0 : index
    %63 = vector.load %arg4[%c1_43, %c0_44, %c0_45] : memref<3x64x128xbf16, #tpu.memory_space<vmem>>, vector<1x64x128xbf16>
    %64 = vector.shape_cast %63 : vector<1x64x128xbf16> to vector<64x128xbf16>
    %cst_46 = arith.constant dense<0.000000e+00> : vector<8x128xf32>
    %65 = tpu.matmul %62, %64, %cst_46 {dimension_numbers = #tpu.dot_dimension_numbers<[1], [0], [0], [1], [0, 0, 1, 1], [], []>} : vector<8x64xbf16>, vector<64x128xbf16>, vector<8x128xf32> -> vector<8x128xf32>
    %c1_47 = arith.constant 1 : index
    %c0_48 = arith.constant 0 : index
    %c0_49 = arith.constant 0 : index
    %66 = vector.load %arg5[%c1_47, %c0_48, %c0_49] : memref<3x1x128xf32, #tpu.memory_space<vmem>>, vector<1x1x128xf32>
    %67 = vector.shape_cast %66 : vector<1x1x128xf32> to vector<1x128xf32>
    %68 = vector.broadcast %67 : vector<1x128xf32> to vector<8x128xf32>
    %69 = arith.addf %65, %68 : vector<8x128xf32>
    %70 = vector.extract_strided_slice %69 {offsets = [0, 0], sizes = [8, 32], strides = [1, 1]} : vector<8x128xf32> to vector<8x32xf32>
    %cst_50 = arith.constant 5.000000e-01 : f32
    %71 = vector.broadcast %cst_50 : f32 to vector<8x32xf32>
    %72 = arith.mulf %71, %70 : vector<8x32xf32>
    %73 = math.tanh %72 : vector<8x32xf32>
    %cst_51 = arith.constant 5.000000e-01 : f32
    %74 = vector.broadcast %cst_51 : f32 to vector<8x32xf32>
    %75 = arith.mulf %74, %73 : vector<8x32xf32>
    %cst_52 = arith.constant 5.000000e-01 : f32
    %76 = vector.broadcast %cst_52 : f32 to vector<8x32xf32>
    %77 = arith.addf %75, %76 : vector<8x32xf32>
    %78 = vector.extract_strided_slice %69 {offsets = [0, 32], sizes = [8, 32], strides = [1, 1]} : vector<8x128xf32> to vector<8x32xf32>
    %cst_53 = arith.constant 5.000000e-01 : f32
    %79 = vector.broadcast %cst_53 : f32 to vector<8x32xf32>
    %80 = arith.mulf %79, %78 : vector<8x32xf32>
    %81 = math.tanh %80 : vector<8x32xf32>
    %cst_54 = arith.constant 5.000000e-01 : f32
    %82 = vector.broadcast %cst_54 : f32 to vector<8x32xf32>
    %83 = arith.mulf %82, %81 : vector<8x32xf32>
    %cst_55 = arith.constant 5.000000e-01 : f32
    %84 = vector.broadcast %cst_55 : f32 to vector<8x32xf32>
    %85 = arith.addf %83, %84 : vector<8x32xf32>
    %86 = vector.extract_strided_slice %69 {offsets = [0, 64], sizes = [8, 32], strides = [1, 1]} : vector<8x128xf32> to vector<8x32xf32>
    %87 = math.tanh %86 : vector<8x32xf32>
    %88 = vector.extract_strided_slice %69 {offsets = [0, 96], sizes = [8, 32], strides = [1, 1]} : vector<8x128xf32> to vector<8x32xf32>
    %cst_56 = arith.constant 5.000000e-01 : f32
    %89 = vector.broadcast %cst_56 : f32 to vector<8x32xf32>
    %90 = arith.mulf %89, %88 : vector<8x32xf32>
    %91 = math.tanh %90 : vector<8x32xf32>
    %cst_57 = arith.constant 5.000000e-01 : f32
    %92 = vector.broadcast %cst_57 : f32 to vector<8x32xf32>
    %93 = arith.mulf %92, %91 : vector<8x32xf32>
    %cst_58 = arith.constant 5.000000e-01 : f32
    %94 = vector.broadcast %cst_58 : f32 to vector<8x32xf32>
    %95 = arith.addf %93, %94 : vector<8x32xf32>
    %c1_59 = arith.constant 1 : index
    %c0_60 = arith.constant 0 : index
    %c0_61 = arith.constant 0 : index
    %96 = vector.load %arg3[%c1_59, %c0_60, %c0_61] : memref<3x8x32xf32, #tpu.memory_space<vmem>>, vector<1x8x32xf32>
    %97 = vector.shape_cast %96 : vector<1x8x32xf32> to vector<8x32xf32>
    %98 = arith.mulf %85, %97 : vector<8x32xf32>
    %99 = arith.mulf %77, %87 : vector<8x32xf32>
    %100 = arith.addf %98, %99 : vector<8x32xf32>
    %101 = math.tanh %100 : vector<8x32xf32>
    %102 = arith.mulf %95, %101 : vector<8x32xf32>
    %c1_62 = arith.constant 1 : index
    %c0_63 = arith.constant 0 : index
    %c0_64 = arith.constant 0 : index
    %103 = vector.load %arg6[%c1_62, %c0_63, %c0_64] : memref<3x8x32xf32, #tpu.memory_space<vmem>>, vector<1x8x32xf32>
    %104 = vector.shape_cast %103 : vector<1x8x32xf32> to vector<8x32xf32>
    %105 = vector.shape_cast %102 : vector<8x32xf32> to vector<1x8x32xf32>
    tpu.vector_store %arg6[%c1_62, %c0_63, %c0_64], %105 {strides = array<i32>} : memref<3x8x32xf32, #tpu.memory_space<vmem>>, vector<1x8x32xf32>,
    %c1_65 = arith.constant 1 : index
    %c0_66 = arith.constant 0 : index
    %c0_67 = arith.constant 0 : index
    %106 = vector.load %arg7[%c1_65, %c0_66, %c0_67] : memref<3x8x32xf32, #tpu.memory_space<vmem>>, vector<1x8x32xf32>
    %107 = vector.shape_cast %106 : vector<1x8x32xf32> to vector<8x32xf32>
    %108 = vector.shape_cast %100 : vector<8x32xf32> to vector<1x8x32xf32>
    tpu.vector_store %arg7[%c1_65, %c0_66, %c0_67], %108 {strides = array<i32>} : memref<3x8x32xf32, #tpu.memory_space<vmem>>, vector<1x8x32xf32>,
    %109 = arith.truncf %102 : vector<8x32xf32> to vector<8x32xbf16>
    %c0_68 = arith.constant 0 : index
    %c0_69 = arith.constant 0 : index
    %110 = vector.load %arg8[%c0_68, %c0_69] : memref<8x64xbf16, #tpu.memory_space<vmem>>, vector<8x32xbf16>
    tpu.vector_store %arg8[%c0_68, %c0_69], %109 {strides = array<i32>} : memref<8x64xbf16, #tpu.memory_space<vmem>>, vector<8x32xbf16>,
    %c2 = arith.constant 2 : index
    %c0_70 = arith.constant 0 : index
    %c0_71 = arith.constant 0 : index
    %111 = vector.load %arg2[%c2, %c0_70, %c0_71] : memref<3x8x32xf32, #tpu.memory_space<vmem>>, vector<1x8x32xf32>
    %112 = vector.shape_cast %111 : vector<1x8x32xf32> to vector<8x32xf32>
    %113 = arith.truncf %112 : vector<8x32xf32> to vector<8x32xbf16>
    %c0_72 = arith.constant 0 : index
    %c32_73 = arith.constant 32 : index
    %114 = vector.load %arg8[%c0_72, %c32_73] : memref<8x64xbf16, #tpu.memory_space<vmem>>, vector<8x32xbf16>
    tpu.vector_store %arg8[%c0_72, %c32_73], %113 {strides = array<i32>} : memref<8x64xbf16, #tpu.memory_space<vmem>>, vector<8x32xbf16>,
    %c0_74 = arith.constant 0 : index
    %c0_75 = arith.constant 0 : index
    %115 = vector.load %arg8[%c0_74, %c0_75] : memref<8x64xbf16, #tpu.memory_space<vmem>>, vector<8x64xbf16>
    %c2_76 = arith.constant 2 : index
    %c0_77 = arith.constant 0 : index
    %c0_78 = arith.constant 0 : index
    %116 = vector.load %arg4[%c2_76, %c0_77, %c0_78] : memref<3x64x128xbf16, #tpu.memory_space<vmem>>, vector<1x64x128xbf16>
    %117 = vector.shape_cast %116 : vector<1x64x128xbf16> to vector<64x128xbf16>
    %cst_79 = arith.constant dense<0.000000e+00> : vector<8x128xf32>
    %118 = tpu.matmul %115, %117, %cst_79 {dimension_numbers = #tpu.dot_dimension_numbers<[1], [0], [0], [1], [0, 0, 1, 1], [], []>} : vector<8x64xbf16>, vector<64x128xbf16>, vector<8x128xf32> -> vector<8x128xf32>
    %c2_80 = arith.constant 2 : index
    %c0_81 = arith.constant 0 : index
    %c0_82 = arith.constant 0 : index
    %119 = vector.load %arg5[%c2_80, %c0_81, %c0_82] : memref<3x1x128xf32, #tpu.memory_space<vmem>>, vector<1x1x128xf32>
    %120 = vector.shape_cast %119 : vector<1x1x128xf32> to vector<1x128xf32>
    %121 = vector.broadcast %120 : vector<1x128xf32> to vector<8x128xf32>
    %122 = arith.addf %118, %121 : vector<8x128xf32>
    %123 = vector.extract_strided_slice %122 {offsets = [0, 0], sizes = [8, 32], strides = [1, 1]} : vector<8x128xf32> to vector<8x32xf32>
    %cst_83 = arith.constant 5.000000e-01 : f32
    %124 = vector.broadcast %cst_83 : f32 to vector<8x32xf32>
    %125 = arith.mulf %124, %123 : vector<8x32xf32>
    %126 = math.tanh %125 : vector<8x32xf32>
    %cst_84 = arith.constant 5.000000e-01 : f32
    %127 = vector.broadcast %cst_84 : f32 to vector<8x32xf32>
    %128 = arith.mulf %127, %126 : vector<8x32xf32>
    %cst_85 = arith.constant 5.000000e-01 : f32
    %129 = vector.broadcast %cst_85 : f32 to vector<8x32xf32>
    %130 = arith.addf %128, %129 : vector<8x32xf32>
    %131 = vector.extract_strided_slice %122 {offsets = [0, 32], sizes = [8, 32], strides = [1, 1]} : vector<8x128xf32> to vector<8x32xf32>
    %cst_86 = arith.constant 5.000000e-01 : f32
    %132 = vector.broadcast %cst_86 : f32 to vector<8x32xf32>
    %133 = arith.mulf %132, %131 : vector<8x32xf32>
    %134 = math.tanh %133 : vector<8x32xf32>
    %cst_87 = arith.constant 5.000000e-01 : f32
    %135 = vector.broadcast %cst_87 : f32 to vector<8x32xf32>
    %136 = arith.mulf %135, %134 : vector<8x32xf32>
    %cst_88 = arith.constant 5.000000e-01 : f32
    %137 = vector.broadcast %cst_88 : f32 to vector<8x32xf32>
    %138 = arith.addf %136, %137 : vector<8x32xf32>
    %139 = vector.extract_strided_slice %122 {offsets = [0, 64], sizes = [8, 32], strides = [1, 1]} : vector<8x128xf32> to vector<8x32xf32>
    %140 = math.tanh %139 : vector<8x32xf32>
    %141 = vector.extract_strided_slice %122 {offsets = [0, 96], sizes = [8, 32], strides = [1, 1]} : vector<8x128xf32> to vector<8x32xf32>
    %cst_89 = arith.constant 5.000000e-01 : f32
    %142 = vector.broadcast %cst_89 : f32 to vector<8x32xf32>
    %143 = arith.mulf %142, %141 : vector<8x32xf32>
    %144 = math.tanh %143 : vector<8x32xf32>
    %cst_90 = arith.constant 5.000000e-01 : f32
    %145 = vector.broadcast %cst_90 : f32 to vector<8x32xf32>
    %146 = arith.mulf %145, %144 : vector<8x32xf32>
    %cst_91 = arith.constant 5.000000e-01 : f32
    %147 = vector.broadcast %cst_91 : f32 to vector<8x32xf32>
    %148 = arith.addf %146, %147 : vector<8x32xf32>
    %c2_92 = arith.constant 2 : index
    %c0_93 = arith.constant 0 : index
    %c0_94 = arith.constant 0 : index
    %149 = vector.load %arg3[%c2_92, %c0_93, %c0_94] : memref<3x8x32xf32, #tpu.memory_space<vmem>>, vector<1x8x32xf32>
    %150 = vector.shape_cast %149 : vector<1x8x32xf32> to vector<8x32xf32>
    %151 = arith.mulf %138, %150 : vector<8x32xf32>
    %152 = arith.mulf %130, %140 : vector<8x32xf32>
    %153 = arith.addf %151, %152 : vector<8x32xf32>
    %154 = math.tanh %153 : vector<8x32xf32>
    %155 = arith.mulf %148, %154 : vector<8x32xf32>
    %c2_95 = arith.constant 2 : index
    %c0_96 = arith.constant 0 : index
    %c0_97 = arith.constant 0 : index
    %156 = vector.load %arg6[%c2_95, %c0_96, %c0_97] : memref<3x8x32xf32, #tpu.memory_space<vmem>>, vector<1x8x32xf32>
    %157 = vector.shape_cast %156 : vector<1x8x32xf32> to vector<8x32xf32>
    %158 = vector.shape_cast %155 : vector<8x32xf32> to vector<1x8x32xf32>
    tpu.vector_store %arg6[%c2_95, %c0_96, %c0_97], %158 {strides = array<i32>} : memref<3x8x32xf32, #tpu.memory_space<vmem>>, vector<1x8x32xf32>,
    %c2_98 = arith.constant 2 : index
    %c0_99 = arith.constant 0 : index
    %c0_100 = arith.constant 0 : index
    %159 = vector.load %arg7[%c2_98, %c0_99, %c0_100] : memref<3x8x32xf32, #tpu.memory_space<vmem>>, vector<1x8x32xf32>
    %160 = vector.shape_cast %159 : vector<1x8x32xf32> to vector<8x32xf32>
    %161 = vector.shape_cast %153 : vector<8x32xf32> to vector<1x8x32xf32>
    tpu.vector_store %arg7[%c2_98, %c0_99, %c0_100], %161 {strides = array<i32>} : memref<3x8x32xf32, #tpu.memory_space<vmem>>, vector<1x8x32xf32>,
    return
  }
  func.func @transform_0(%arg0: i32) -> (i32, i32) {
    %c0_i32 = arith.constant 0 : i32
    %c0_i32_0 = arith.constant 0 : i32
    %c0_i32_1 = arith.constant 0 : i32
    return %c0_i32, %c0_i32_0 : i32, i32
  }
  func.func @transform_1(%arg0: i32) -> (i32, i32, i32) {
    %c0_i32 = arith.constant 0 : i32
    %c0_i32_0 = arith.constant 0 : i32
    %c0_i32_1 = arith.constant 0 : i32
    %c0_i32_2 = arith.constant 0 : i32
    return %c0_i32, %c0_i32_0, %c0_i32_1 : i32, i32, i32
  }
  func.func @transform_2(%arg0: i32) -> (i32, i32, i32) {
    %c0_i32 = arith.constant 0 : i32
    %c0_i32_0 = arith.constant 0 : i32
    %c0_i32_1 = arith.constant 0 : i32
    %c0_i32_2 = arith.constant 0 : i32
    return %c0_i32, %c0_i32_0, %c0_i32_1 : i32, i32, i32
  }
  func.func @transform_3(%arg0: i32) -> (i32, i32, i32) {
    %c0_i32 = arith.constant 0 : i32
    %c0_i32_0 = arith.constant 0 : i32
    %c0_i32_1 = arith.constant 0 : i32
    %c0_i32_2 = arith.constant 0 : i32
    return %c0_i32, %c0_i32_0, %c0_i32_1 : i32, i32, i32
  }
  func.func @transform_4(%arg0: i32) -> (i32, i32, i32) {
    %c0_i32 = arith.constant 0 : i32
    %c0_i32_0 = arith.constant 0 : i32
    %c0_i32_1 = arith.constant 0 : i32
    %c0_i32_2 = arith.constant 0 : i32
    return %c0_i32, %c0_i32_0, %c0_i32_1 : i32, i32, i32
  }
  func.func @transform_5(%arg0: i32) -> (i32, i32, i32) {
    %c0_i32 = arith.constant 0 : i32
    %c0_i32_0 = arith.constant 0 : i32
    %c0_i32_1 = arith.constant 0 : i32
    %c0_i32_2 = arith.constant 0 : i32
    return %c0_i32, %c0_i32_0, %c0_i32_1 : i32, i32, i32
  }
  func.func @transform_6(%arg0: i32) -> (i32, i32, i32) {
    %c0_i32 = arith.constant 0 : i32
    %c0_i32_0 = arith.constant 0 : i32
    %c0_i32_1 = arith.constant 0 : i32
    %c0_i32_2 = arith.constant 0 : i32
    return %c0_i32, %c0_i32_0, %c0_i32_1 : i32, i32, i32
  }
}

</mosaic_0001>

<bundles_post_ra>
// kernel: stacked_lstm_forward.1
= control target key start
LH: loop header
LB: loop body
LE: loop exit
PB: predicated region body
PF: predicated region fallthrough
CT: control target
= control target key end

     0   :  { %12 = vsyncpa [#allocation4], 0  ;;  %s914_s0 = inlined_call_operand.hbm [shape: f32[8,16], index: 0, kind: input, shape index: {}]   ;;  %s915_s1 = inlined_call_operand.hbm [shape: f32[3,8,32], index: 1, kind: input, shape index: {}]   ;;  %s916_s2 = inlined_call_operand.hbm [shape: f32[3,8,32], index: 2, kind: input, shape index: {}]   ;;  %s917_s3 = inlined_call_operand.hbm [shape: bf16[3,64,128], index: 3, kind: input, shape index: {}]   ;;  %s918_s4 = inlined_call_operand.vmem [shape: f32[3,1,128], index: 4, kind: input, shape index: {}]   ;;  %s919_s5 = inlined_call_operand.vmem [shape: f32[3,8,32], index: 5, kind: output, shape index: {0}]   ;;  %s920_s6 = inlined_call_operand.hbm [shape: f32[3,8,32], index: 6, kind: output, shape index: {1}]  }
   0x1   :  { %13 = vsyncpa [#allocation7], 0 }
   0x2   :  { %14 = vsyncpa [#allocation10], 0 }
   0x3   :  { %15 = vsyncpa [#allocation5], 0  ;;  %s760_s21 = smov [#allocation6]  }
   0x4   :  { %s31_s22 = sshll.u32 %s760_s21, 4  ;;  %s32_s22 = int_to_ptr.vmem [resolvable:$true] %s31_s22 }
   0x5   :  { %s660_s23 = scalar_lea.vmem %s32_s22, 384  ;;  %p665_p1 = scmp.lt.s32.totalorder %s32_s22, %s32_s22 }
   0x6   :  { %p661_p0 = scmp.ne.s32.totalorder %s32_s22, %s660_s23  ;;  %p666_p2 = scmp.lt.s32.totalorder %s660_s23, %s660_s23 }
   0x8   :  { %p667_p3 = por %p666_p2, %p665_p1 }
   0xa   :  { %p668_p4 = pnand %p667_p3, %p661_p0 }
   0xc   :  { %671 = shalt.err (!%p668_p4)
}
   0xd   :  { %s761_s24 = smov 128   ;;  %s762_s25 = smov 8  }
   0xe   :  { %37 = dma.hbm_to_vmem [thread:$0]  %s915_s1, 384, %s32_s22, [#allocation7], %s761_s24, %s761_s24, %s762_s25  }
   0xf   :  { %s763_s28 = smov [#allocation3]   ;;  %s764_s30 = smov [#allocation8]  }
  0x10   :  { %s22_s29 = sshll.u32 %s763_s28, 4  ;;  %s43_s7 = sshll.u32 %s764_s30, 4  ;;  %s23_s29 = int_to_ptr.vmem [resolvable:$true] %s22_s29  ;;  %s44_s7 = int_to_ptr.vmem [resolvable:$true] %s43_s7 }
  0x11   :  { %s680_s8 = scalar_lea.vmem %s23_s29, 128  ;;  %p685_p6 = scmp.lt.s32.totalorder %s23_s29, %s23_s29 }
  0x12   :  { %p681_p5 = scmp.ne.s32.totalorder %s23_s29, %s680_s8  ;;  %p686_p7 = scmp.lt.s32.totalorder %s680_s8, %s680_s8 }
  0x14   :  { %p687_p8 = por %p686_p7, %p685_p6 }
  0x16   :  { %p688_p9 = pnand %p687_p8, %p681_p5 }
  0x18   :  { %691 = shalt.err (!%p688_p9)
}
  0x19   :  { %25 = dma.hbm_to_vmem [thread:$0]  %s914_s0, 128, %s23_s29, [#allocation4]  }
  0x1a   :  { %s700_s11 = scalar_lea.vmem %s44_s7, 384  ;;  %p705_p11 = scmp.lt.s32.totalorder %s44_s7, %s44_s7 }
  0x1b   :  { %p701_p10 = scmp.ne.s32.totalorder %s44_s7, %s700_s11  ;;  %p706_p12 = scmp.lt.s32.totalorder %s700_s11, %s700_s11 }
  0x1d   :  { %p707_p13 = por %p706_p12, %p705_p11 }
  0x1f   :  { %p708_p0 = pnand %p707_p13, %p701_p10 }
  0x21   :  { %711 = shalt.err (!%p708_p0)
}
  0x22   :  { %49 = dma.hbm_to_vmem [thread:$0]  %s916_s2, 384, %s44_s7, [#allocation7], %s761_s24, %s761_s24, %s762_s25  }
  0x23   :  { %s765_s13 = smov [#allocation9]  }
  0x24   :  { %s55_s14 = sshll.u32 %s765_s13, 4  ;;  %s56_s14 = int_to_ptr.vmem [resolvable:$true] %s55_s14 }
  0x25   :  { %s720_s15 = scalar_lea.vmem %s56_s14, 1536  ;;  %p725_p2 = scmp.lt.s32.totalorder %s56_s14, %s56_s14 }
  0x26   :  { %p721_p1 = scmp.ne.s32.totalorder %s56_s14, %s720_s15  ;;  %p726_p3 = scmp.lt.s32.totalorder %s720_s15, %s720_s15 }
  0x28   :  { %p727_p4 = por %p726_p3, %p725_p2 }
  0x2a   :  { %p728_p5 = pnand %p727_p4, %p721_p1 }
  0x2c   :  { %731 = shalt.err (!%p728_p5)
}
  0x2d   :  { %s766_s0 = smov 64   ;;  %s767_s16 = smov 4  }
  0x2e   :  { %61 = dma.hbm_to_vmem [thread:$0]  %s917_s3, 1536, %s56_s14, [#allocation10], %s766_s0, %s766_s0, %s767_s16  }
  0x2f   :  { %752 = dma.done.wait [#allocation4], 128  }
  0x30   :  { %753 = vsyncadd [#allocation4], 4294967168 }
  0x31   :  { %754 = dma.done.wait [#allocation7], 768  }
  0x32   :  { %755 = vsyncadd [#allocation7], 4294966528 }
  0x33   :  { %756 = dma.done.wait [#allocation10], 1536  }
  0x34   :  { %757 = vsyncadd [#allocation10], 4294965760  ;;  %v768_v0 = vmov 0.0   ;;  %vm769_vm0 = vmmov 0   ;;  %v83_v1 = vld [vmem:[#allocation6] sm:$0xff]  ;;  %v622_v3 = vld [vmem:[#allocation9 + $0x18] sm:$0xff]  }
  0x35   :  { %572 = vmatprep.subr.bf16.mxu0 %v768_v0  ;;  %584 = vmatprep.subr.bf16.mxu1 %v768_v0  ;;  %v552_v2 = vpack.c.bf16 %v83_v1, %v83_v1  ;;  %vm79_vm1 = vcmask 125952   ;;  %vm81_vm2 = vcmask 257152   ;;  %v77_v4 = vld [vmem:[#allocation3] sm:$0xff]  ;;  %s770_s2 = smov 32   ;;  %v623_v5 = vld [vmem:[#allocation9 + $0x10] sm:$0xff]   ;;  %v771_v9 = vmov 0  }
  0x36   :  { %580 = vmatprep.mubr.msk.bf16.mxu0 %vm769_vm0, %v768_v0  ;;  %592 = vmatprep.mubr.msk.bf16.mxu1 %vm769_vm0, %v768_v0  ;;  %v78_v6 = vpack.c.bf16 %v77_v4, %v77_v4  ;;  %v182_v7 = vld [vmem:[#allocation8] sm:$0xff]  ;;  %v625_v10 = vld [vmem:[#allocation9] sm:$0xff]   ;;  %vm91_vm3 = vcmask 519424   ;;  %vm133_vm4 = vcmask 523264   ;;  %v626_v30 = vld [vmem:[#allocation9 + $0x38] sm:$0xff]   ;;  %vm222_vm5 = vcmask 257024  }
  0x37   :  { %88 = vrot.lane.b32.xlu0 %v552_v2, %s770_s2  ;;  %573 = vmatpush3.bf16.msra.mxu0 %v622_v3  ;;  %v624_v8 = vld [vmem:[#allocation9 + $0x8] sm:$0xff]   ;;  %v526_v13 = vld [vmem:[%s918_s4] ss:$0 sm:$0xff]  ;;  %v627_v31 = vld [vmem:[#allocation9 + $0x30] sm:$0xff]   ;;  %s772_s26 = smov 96   ;;  %vm208_vm6 = vcmask 261120  }
  0x38   :  { %574 = vmatprep.subr.bf16.mxu0 %v768_v0  ;;  %80 = vst.msk [vmem:[#allocation2] sm:$0xf] %vm79_vm1, %v78_v6  ;;  %184 = vrot.lane.b32.xlu1 %v182_v7, %s770_s2  ;;  %v225_v32 = vld [vmem:[#allocation6 + $0x8] sm:$0xff]  ;;  %v628_v35 = vld [vmem:[#allocation9 + $0x28] sm:$0xff]   ;;  %v629_v36 = vld [vmem:[#allocation9 + $0x20] sm:$0xff]   ;;  %s773_s28 = smov [#allocation11]  }
  0x39   :  { %82 = vst.msk [vmem:[#allocation2] sm:$0xf] %vm81_vm2, %v771_v9  ;;  %585 = vmatpush3.bf16.msra.mxu1 %v626_v30  ;;  %v554_v34 = vpack.c.bf16 %v225_v32, %v225_v32  ;;  %v325_v39 = vld [vmem:[#allocation8 + $0x8] sm:$0xff]  ;;  %v535_v44 = vld [vmem:[%s918_s4 + $0x1] ss:$0 sm:$0xff]  ;;  %v630_v61 = vld [vmem:[#allocation9 + $0x58] sm:$0xff]  }
  0x3a   :  { %586 = vmatprep.subr.bf16.mxu1 %v768_v0  ;;  %v631_v62 = vld [vmem:[#allocation9 + $0x50] sm:$0xff]   ;;  %v368_v63 = vld [vmem:[#allocation6 + $0x10] sm:$0xff]  ;;  %v632_v3 = vld [vmem:[#allocation9 + $0x48] sm:$0xff]   ;;  %s509_s29 = sshll.u32 %s773_s28, 4  ;;  %s510_s29 = int_to_ptr.vmem [resolvable:$true] %s509_s29 }
  0x3b   :  { %575 = vmatpush3.bf16.msra.mxu0 %v623_v5  ;;  %v556_v2 = vpack.c.bf16 %v368_v63, %v368_v63  ;;  %v633_v4 = vld [vmem:[#allocation9 + $0x40] sm:$0xff]   ;;  %v468_v7 = vld [vmem:[#allocation8 + $0x10] sm:$0xff]  ;;  %s732_s30 = scalar_lea.vmem %s510_s29, 384  ;;  %p737_p7 = scmp.lt.s32.totalorder %s510_s29, %s510_s29 }
  0x3c   :  { %576 = vmatprep.subr.bf16.mxu0 %v768_v0  ;;  %p733_p6 = scmp.ne.s32.totalorder %s510_s29, %s732_s30  ;;  %p738_p8 = scmp.lt.s32.totalorder %s732_s30, %s732_s30 }
  0x3d   :  { %587 = vmatpush3.bf16.msra.mxu1 %v627_v31 }
  0x3e   :  { %588 = vmatprep.subr.bf16.mxu1 %v768_v0  ;;  %p739_p9 = por %p738_p8, %p737_p7 }
  0x3f   :  { %577 = vmatpush3.bf16.msra.mxu0 %v624_v8 }
  0x40   :  { %578 = vmatprep.subr.bf16.mxu0 %v768_v0  ;;  %p740_p10 = pnand %p739_p9, %p733_p6 }
  0x41   :  { %589 = vmatpush3.bf16.msra.mxu1 %v628_v35 }
  0x42   :  { %590 = vmatprep.subr.bf16.mxu1 %v768_v0 }
  0x43   :  { %579 = vmatpush3.bf16.msra.mxu0 %v625_v10 }
  0x44   :  { %596 = vmatprep.subr.bf16.mxu0 %v768_v0 }
  0x45   :  { %591 = vmatpush3.bf16.msra.mxu1 %v629_v36 }
  0xa9   :  { %v89_v11 = vpop.permute.xlu0 %88 }
  0xaa   :  { %92 = vst.msk [vmem:[#allocation2] sm:$0xf] %vm91_vm3, %v89_v11  ;;  %v185_v26 = vpop.permute.xlu1 %184 }
  0xb1   :  { %v93_v12 = vld [vmem:[#allocation2] sm:$0xf] }
  0xb2   :  { %581 = vmatmul.mubr.msk.bf16.vlgmr.msra.gmra.mxu0 %vm133_vm4, %v93_v12 }
  0xb3   :  { %604 = vmatprep.mubr.msk.bf16.mxu0 %vm769_vm0, %v768_v0  ;;  %597 = vmatpush3.bf16.msra.mxu0 %v630_v61 }
  0xb4   :  { %598 = vmatprep.subr.bf16.mxu0 %v768_v0 }
  0xb7   :  { %599 = vmatpush3.bf16.msra.mxu0 %v631_v62 }
  0xb8   :  { %600 = vmatprep.subr.bf16.mxu0 %v768_v0 }
  0xbb   :  { %601 = vmatpush3.bf16.msra.mxu0 %v632_v3 }
  0xbc   :  { %602 = vmatprep.subr.bf16.mxu0 %v768_v0  ;;  %v545_v0 = vld [vmem:[%s918_s4 + $0x2] ss:$0 sm:$0xff] }
  0xbf   :  { %603 = vmatpush3.bf16.msra.mxu0 %v633_v4 }
 0x172   :  { %v171_v14 = vpop.f32.mrf.mxu0 }
 0x173   :  { %v172_v15 = vadd.f32 %v526_v13, %v171_v14 }
 0x174   :  { %v582_v16 = vpop.f32.mrf.mxu0 }
 0x175   :  { %634 = vtanh.f32 %v172_v15  ;;  %v177_v20 = vmul.f32 0.5, %v172_v15 }
 0x176   :  { %v174_v17 = vpop.f32.mrf.mxu0 }
 0x177   :  { %636 = vtanh.f32 %v177_v20 }
 0x178   :  { %v583_v18 = vpop.f32.mrf.mxu0 }
 0x182   :  { %v635_v19 = vpop.eup %634 }
 0x183   :  { %189 = vrot.lane.b32.xlu0 %v635_v19, %s766_s0 }
 0x184   :  { %v637_v21 = vpop.eup %636 }
 0x185   :  { %v179_v22 = vmul.f32 0.5, %v637_v21 }
 0x187   :  { %v180_v23 = vadd.f32 0.5, %v179_v22 }
 0x189   :  { %v187_v27 = vmul.f32 %v185_v26, %v180_v23 }
 0x1f5   :  { %v190_v24 = vpop.permute.xlu0 %189 }
 0x1f6   :  { %v192_v25 = vmul.f32 %v190_v24, %v180_v23 }
 0x1f8   :  { %194 = vrot.lane.b32.xlu1 %v192_v25, %s770_s2 }
 0x26a   :  { %v195_v28 = vpop.permute.xlu1 %194 }
 0x26b   :  { %v850_v29 = vadd.f32 %v195_v28, %v187_v27 }
 0x26d   :  { %638 = vtanh.f32 %v850_v29 }
 0x27a   :  { %v639_v33 = vpop.eup %638 }
 0x27b   :  { %200 = vrot.lane.b32.xlu0 %v639_v33, %s766_s0 }
 0x27f   :  { %230 = vrot.lane.b32.xlu0 %v554_v34, %s770_s2 }
 0x283   :  { %327 = vrot.lane.b32.xlu0 %v325_v39, %s770_s2 }
 0x2ed   :  { %v201_v37 = vpop.permute.xlu0 %200 }
 0x2ee   :  { %v858_v38 = vmul.f32 %v201_v37, %v180_v23 }
 0x2f0   :  { %v553_v40 = vpack.c.bf16 %v858_v38, %v858_v38 }
 0x2f1   :  { %v231_v41 = vpop.permute.xlu0 %230 }
 0x2f2   :  { %219 = vrot.lane.b32.xlu1 %v553_v40, %s770_s2 }
 0x2f5   :  { %v328_v57 = vpop.permute.xlu0 %327 }
 0x364   :  { %v220_v42 = vpop.permute.xlu1 %219 }
 0x365   :  { %223 = vst.msk [vmem:[#allocation2] sm:$0xf] %vm222_vm5, %v220_v42 }
 0x366   :  { %233 = vst.msk [vmem:[#allocation2] sm:$0xf] %vm91_vm3, %v231_v41 }
 0x36d   :  { %v234_v43 = vld [vmem:[#allocation2] sm:$0xf] }
 0x36e   :  { %593 = vmatmul.mubr.msk.bf16.vlgmr.msra.gmra.mxu1 %vm133_vm4, %v234_v43 }
 0x42e   :  { %v313_v45 = vpop.f32.mrf.mxu1 }
 0x42f   :  { %v314_v46 = vadd.f32 %v535_v44, %v313_v45 }
 0x430   :  { %v594_v47 = vpop.f32.mrf.mxu1 }
 0x431   :  { %640 = vtanh.f32 %v314_v46  ;;  %v319_v51 = vmul.f32 0.5, %v314_v46 }
 0x432   :  { %v316_v48 = vpop.f32.mrf.mxu1 }
 0x433   :  { %642 = vtanh.f32 %v319_v51 }
 0x434   :  { %v595_v49 = vpop.f32.mrf.mxu1 }
 0x43e   :  { %v641_v50 = vpop.eup %640 }
 0x43f   :  { %332 = vrot.lane.b32.xlu1 %v641_v50, %s766_s0 }
 0x440   :  { %v643_v52 = vpop.eup %642 }
 0x441   :  { %v321_v53 = vmul.f32 0.5, %v643_v52 }
 0x443   :  { %v322_v54 = vadd.f32 0.5, %v321_v53 }
 0x445   :  { %v330_v58 = vmul.f32 %v328_v57, %v322_v54 }
 0x4b1   :  { %v333_v55 = vpop.permute.xlu1 %332 }
 0x4b2   :  { %v335_v56 = vmul.f32 %v333_v55, %v322_v54 }
 0x4b4   :  { %337 = vrot.lane.b32.xlu1 %v335_v56, %s770_s2 }
 0x526   :  { %v338_v59 = vpop.permute.xlu1 %337 }
 0x527   :  { %v340_v60 = vadd.f32 %v338_v59, %v330_v58 }
 0x529   :  { %644 = vtanh.f32 %v340_v60 }
 0x536   :  { %v645_v1 = vpop.eup %644 }
 0x537   :  { %343 = vrot.lane.b32.xlu0 %v645_v1, %s766_s0 }
 0x53b   :  { %373 = vrot.lane.b32.xlu0 %v556_v2, %s770_s2 }
 0x53f   :  { %470 = vrot.lane.b32.xlu0 %v468_v7, %s770_s2 }
 0x5a9   :  { %v344_v5 = vpop.permute.xlu0 %343 }
 0x5aa   :  { %v346_v6 = vmul.f32 %v344_v5, %v322_v54 }
 0x5ac   :  { %v555_v8 = vpack.c.bf16 %v346_v6, %v346_v6 }
 0x5ad   :  { %v374_v9 = vpop.permute.xlu0 %373 }
 0x5ae   :  { %363 = vrot.lane.b32.xlu1 %v555_v8, %s770_s2 }
 0x5b1   :  { %v471_v24 = vpop.permute.xlu0 %470 }
 0x620   :  { %v364_v10 = vpop.permute.xlu1 %363 }
 0x621   :  { %366 = vst.msk [vmem:[#allocation2] sm:$0xf] %vm222_vm5, %v364_v10 }
 0x622   :  { %376 = vst.msk [vmem:[#allocation2] sm:$0xf] %vm91_vm3, %v374_v9 }
 0x629   :  { %v377_v11 = vld [vmem:[#allocation2] sm:$0xf] }
 0x62a   :  { %605 = vmatmul.mubr.msk.bf16.vlgmr.msra.gmra.mxu0 %vm133_vm4, %v377_v11 }
 0x6ea   :  { %v456_v12 = vpop.f32.mrf.mxu0 }
 0x6eb   :  { %v457_v13 = vadd.f32 %v545_v0, %v456_v12 }
 0x6ec   :  { %v606_v14 = vpop.f32.mrf.mxu0 }
 0x6ed   :  { %646 = vtanh.f32 %v457_v13  ;;  %v462_v18 = vmul.f32 0.5, %v457_v13 }
 0x6ee   :  { %v459_v15 = vpop.f32.mrf.mxu0 }
 0x6ef   :  { %648 = vtanh.f32 %v462_v18 }
 0x6f0   :  { %v607_v16 = vpop.f32.mrf.mxu0 }
 0x6fa   :  { %v647_v17 = vpop.eup %646 }
 0x6fb   :  { %475 = vrot.lane.b32.xlu1 %v647_v17, %s766_s0 }
 0x6fc   :  { %v649_v19 = vpop.eup %648 }
 0x6fd   :  { %v464_v20 = vmul.f32 0.5, %v649_v19 }
 0x6ff   :  { %v465_v21 = vadd.f32 0.5, %v464_v20 }
 0x701   :  { %v473_v25 = vmul.f32 %v471_v24, %v465_v21 }
 0x76d   :  { %v476_v22 = vpop.permute.xlu1 %475 }
 0x76e   :  { %v478_v23 = vmul.f32 %v476_v22, %v465_v21 }
 0x770   :  { %480 = vrot.lane.b32.xlu1 %v478_v23, %s770_s2 }
 0x774   :  { %211 = vrot.lane.b32.xlu1 %v850_v29, %s772_s26 }
 0x7e2   :  { %v481_v26 = vpop.permute.xlu1 %480 }
 0x7e3   :  { %v483_v27 = vadd.f32 %v481_v26, %v473_v25 }
 0x7e5   :  { %650 = vtanh.f32 %v483_v27  ;;  %497 = vrot.lane.b32.xlu1 %v483_v27, %s772_s26 }
 0x7e6   :  { %v212_v28 = vpop.permute.xlu1 %211 }
 0x7e7   :  { %214 = vst.msk [vmem:[#allocation11] sm:$0xff] %vm208_vm6, %v212_v28 }
 0x7e9   :  { %348 = vrot.lane.b32.xlu1 %v346_v6, %s770_s2 }
 0x7f2   :  { %v651_v30 = vpop.eup %650 }
 0x7f3   :  { %486 = vrot.lane.b32.xlu0 %v651_v30, %s766_s0 }
 0x7f7   :  { %354 = vrot.lane.b32.xlu0 %v340_v60, %s772_s26 }
 0x7fb   :  { %205 = vrot.lane.b32.xlu0 %v858_v38, %s770_s2 }
 0x857   :  { %v498_v29 = vpop.permute.xlu1 %497 }
 0x858   :  { %501 = vst.msk [vmem:[#allocation11 + $0x10] sm:$0xff] %vm208_vm6, %v498_v29 }
 0x85b   :  { %v349_v31 = vpop.permute.xlu1 %348 }
 0x85c   :  { %541 = vst.msk [vmem:[%s919_s5 + $0x8] sm:$0xff] %vm208_vm6, %v349_v31 }
 0x865   :  { %v487_v32 = vpop.permute.xlu0 %486 }
 0x866   :  { %v489_v33 = vmul.f32 %v487_v32, %v465_v21 }
 0x868   :  { %491 = vrot.lane.b32.xlu0 %v489_v33, %s770_s2 }
 0x869   :  { %v355_v34 = vpop.permute.xlu0 %354 }
 0x86a   :  { %358 = vst.msk [vmem:[#allocation11 + $0x8] sm:$0xff] %vm208_vm6, %v355_v34 }
 0x86b   :  { %743 = shalt.err (!%p740_p10)
}
 0x86c   :  { %515 = dma.vmem_to_hbm [thread:$0]  %s510_s29, 384, %s920_s6, [#allocation5], %s761_s24, %s761_s24, %s762_s25  }
 0x86d   :  { %v206_v35 = vpop.permute.xlu0 %205 }
 0x86e   :  { %209 = vst.msk [vmem:[%s919_s5] sm:$0xff] %vm208_vm6, %v206_v35 }
 0x8da   :  { %v492_v36 = vpop.permute.xlu0 %491 }
 0x8db   :  { %551 = vst.msk [vmem:[%s919_s5 + $0x10] sm:$0xff] %vm208_vm6, %v492_v36 }
 0x8dc   :  { %758 = dma.done.wait [#allocation5], 384  }
 0x8dd   :  { %759 = vsyncadd [#allocation5], 4294966912 }
 0x8de   :  { %521 = vsyncpa [#allocation4], 1 }
 0x8df   :  { %522 = vsyncpa [#allocation7], 1 }
 0x8e0   :  { %523 = vsyncpa [#allocation10], 1 }
 0x8e1   :  { %524 = vsyncpa [#allocation5], 1 }

</bundles_post_ra>
